<compile_context>
chip_gen: v7x
topology: tpu7x:2x2x1
jax: 0.10.0
libtpu: 0.0.40
codegen_flags: <defaults>
</compile_context>

<pallas_src>
import functools
import math

import jax
import jax.numpy as jnp
from jax.experimental import pallas as pl
from jax.experimental.pallas import tpu as pltpu


def mha_kernel(xq_ref, xk_ref, xv_ref,
               wq_ref, bq_ref, wk_ref, bk_ref, wv_ref, bv_ref,
               woh_ref, bo_ref,
               o_ref,
               *, n_heads: int, seq_len: int, compute_dtype, approx_recip: bool):
    """One grid step == `batch_block` batch elements, rows flattened to 2-D."""
    rows, d_model = xq_ref.shape
    S = seq_len
    Bb = rows // S                       # batch elements in this block
    H = n_heads
    hd = d_model // H
    scale = 1.0 / math.sqrt(float(d_model))   # reference divides by sqrt(d_model)
    cd = compute_dtype
    f32 = jnp.float32

    # ---- dense Q/K/V projections over the whole row block (3 MXU matmuls) ----
    q = jnp.dot(xq_ref[...].astype(cd), wq_ref[...],
                preferred_element_type=f32) + bq_ref[...]
    k = jnp.dot(xk_ref[...].astype(cd), wk_ref[...],
                preferred_element_type=f32) + bk_ref[...]
    v = jnp.dot(xv_ref[...].astype(cd), wv_ref[...],
                preferred_element_type=f32) + bv_ref[...]
    q = q * scale                        # fold the scale once into q

    # ---- regroup to (Bb*H, S, hd): batch*heads as the einsum batch dim ------
    def split_heads(z):
        return jnp.stack(
            [z[b * S:(b + 1) * S, h * hd:(h + 1) * hd]
             for b in range(Bb) for h in range(H)], axis=0).astype(cd)

    qh = split_heads(q)                  # (Bb*H, S, hd)
    kh = split_heads(k)
    vh = split_heads(v)

    # ---- batched scaled-dot-product attention (one MXU stream) --------------
    s = jnp.einsum('gqd,gkd->gqk', qh, kh, preferred_element_type=f32)  # (G,S,S)
    # TODO(synk): optional additive attention mask would be applied to `s` here
    #             (forward is exercised with mask=None, matching the reference).
    m = jnp.max(s, axis=-1, keepdims=True)
    p = jnp.exp(s - m)                   # softmax kept in f32 (v5e has no bf16 EUP)
    denom = jnp.sum(p, axis=-1, keepdims=True)
    if approx_recip:
        p = p * pl.reciprocal(denom, approx=True)   # EUP vrcp slot, ~free
    else:
        p = p / denom
    ctx = jnp.einsum('gqk,gkd->gqd', p.astype(cd), vh,
                     preferred_element_type=f32)     # (Bb*H, S, hd)

    # ---- output projection: accumulate through Wo per head (no lane concat) --
    # woh_ref is (H, hd, D): out[b] = sum_h ctx[b,h] @ Wo[h*hd:(h+1)*hd, :] + bo
    woh = woh_ref[...]
    for b in range(Bb):                  # static, small batch block
        ctx_b = ctx[b * H:(b + 1) * H]   # (H, S, hd) leading-axis slice
        oh = jnp.einsum('hqd,hde->hqe', ctx_b.astype(cd), woh,
                        preferred_element_type=f32)  # (H, S, D)
        out_b = bo_ref[...]
        for h in range(H):
            out_b = out_b + oh[h]
        o_ref[b * S:(b + 1) * S, :] = out_b.astype(o_ref.dtype)


def multi_head_attention(query, key, value, params, *, n_heads: int,
                         batch_block=None, compute_dtype=jnp.float32,
                         approx_recip: bool = True):
    """query/key/value: (B, S, D) f32.  compute_dtype: MXU operand dtype
    (bf16 recommended on v6e/v7x); accumulation and softmax stay f32."""
    B, S, D = query.shape
    assert D % n_heads == 0
    hd = D // n_heads

    # Block several batch elements per grid step (amortizes ~0.35us/step and
    # raises MXU row occupancy); aim for >=128 rows per step, never > B.
    if batch_block is None:
        batch_block = max(1, min(B, pl.cdiv(128, S)))
        while B % batch_block:
            batch_block -= 1
    assert B % batch_block == 0
    rows = batch_block * S
    if rows % 8 != 0 and batch_block != B:
        batch_block, rows = B, B * S     # keep the block sublane-aligned

    cd = compute_dtype
    # Flatten (B, S, D) -> (B*S, D) outside the kernel (free XLA reshape) so the
    # kernel sees 2-D row blocks and the projections are single dense matmuls.
    q2 = query.reshape(B * S, D)
    k2 = key.reshape(B * S, D)
    v2 = value.reshape(B * S, D)

    wq = params["wq"].astype(cd)
    wk = params["wk"].astype(cd)
    wv = params["wv"].astype(cd)
    # Output projection pre-split per head: (D, D) -> (H, hd, D) so the kernel
    # accumulates through Wo head-by-head (deletes the lane-axis concat).
    wo_h = params["wo"].reshape(n_heads, hd, D).astype(cd)
    bq = params["bq"].reshape(1, D).astype(jnp.float32)
    bk = params["bk"].reshape(1, D).astype(jnp.float32)
    bv = params["bv"].reshape(1, D).astype(jnp.float32)
    bo = params["bo"].reshape(1, D).astype(jnp.float32)

    kernel = functools.partial(mha_kernel, n_heads=n_heads, seq_len=S,
                               compute_dtype=cd, approx_recip=approx_recip)

    act_spec = pl.BlockSpec((rows, D), lambda i: (i, 0))
    w_spec = pl.BlockSpec((D, D), lambda i: (0, 0))
    woh_spec = pl.BlockSpec((n_heads, hd, D), lambda i: (0, 0, 0))
    b_spec = pl.BlockSpec((1, D), lambda i: (0, 0))

    # NOTE: at realistic d_model on v7x (64 MiB VMEM), single-buffer the weight
    # blocks (memory_space=pl.ANY + one-time copy) and set vmem_limit_bytes;
    # unnecessary at these toy sizes.  Output last dim is D lanes; for D>=128
    # the stores are naturally lane-dense.
    out2 = pl.pallas_call(
        kernel,
        out_shape=jax.ShapeDtypeStruct((B * S, D), query.dtype),
        grid_spec=pltpu.PrefetchScalarGridSpec(
            num_scalar_prefetch=0,
            grid=(B // batch_block,),
            in_specs=[act_spec, act_spec, act_spec,
                      w_spec, b_spec, w_spec, b_spec, w_spec, b_spec,
                      woh_spec, b_spec],
            out_specs=act_spec,
        ),
        compiler_params=pltpu.CompilerParams(
            dimension_semantics=("parallel",)),
    )(q2, k2, v2, wq, bq, wk, bk, wv, bv, wo_h, bo)
    return out2.reshape(B, S, D)


def reference_mha(query, key, value, params, *, n_heads: int):
    """Pure-JAX reference mirroring the PyTorch module exactly."""
    B, S, D = query.shape
    hd = D // n_heads

    def lin(x, w, b):
        return x @ w + b

    q = lin(query, params["wq"], params["bq"]).reshape(B, S, n_heads, hd).transpose(0, 2, 1, 3)
    k = lin(key, params["wk"], params["bk"]).reshape(B, S, n_heads, hd).transpose(0, 2, 1, 3)
    v = lin(value, params["wv"], params["bv"]).reshape(B, S, n_heads, hd).transpose(0, 2, 1, 3)

    scores = jnp.einsum("bhqd,bhkd->bhqk", q, k) / math.sqrt(float(D))
    p = jax.nn.softmax(scores, axis=-1)
    ctx = jnp.einsum("bhqk,bhkd->bhqd", p, v)
    concat = ctx.transpose(0, 2, 1, 3).reshape(B, S, D)
    return lin(concat, params["wo"], params["bo"])


def init_params(key, d_model):
    """Deterministic nn.Linear-like init: W ~ U(-1/sqrt(D), 1/sqrt(D))."""
    ks = jax.random.split(key, 8)
    bound = 1.0 / math.sqrt(d_model)

    def u(k, shape):
        return jax.random.uniform(k, shape, jnp.float32, -bound, bound)

    return {
        "wq": u(ks[0], (d_model, d_model)), "bq": u(ks[1], (1, d_model)),
        "wk": u(ks[2], (d_model, d_model)), "bk": u(ks[3], (1, d_model)),
        "wv": u(ks[4], (d_model, d_model)), "bv": u(ks[5], (1, d_model)),
        "wo": u(ks[6], (d_model, d_model)), "bo": u(ks[7], (1, d_model)),
    }


if __name__ == "__main__":
    B, S, D, H = 2, 8, 32, 4   # batch, seq, d_model, n_heads (head_dim = 8)

    root = jax.random.PRNGKey(0)
    kp, kq, kk, kv = jax.random.split(root, 4)
    params = init_params(kp, D)

    query = jax.random.normal(kq, (B, S, D), jnp.float32)
    key_ = jax.random.normal(kk, (B, S, D), jnp.float32)
    value = jax.random.normal(kv, (B, S, D), jnp.float32)

    ref = reference_mha(query, key_, value, params, n_heads=H)

    # 1) validation-grade run: f32 operands, exact softmax divide, tight check.
    out = multi_head_attention(query, key_, value, params, n_heads=H,
                               compute_dtype=jnp.float32, approx_recip=False)
    out = jax.block_until_ready(out)
    assert out.shape == (B, S, D)
    assert jnp.allclose(out, ref, atol=1e-4, rtol=1e-4), (
        f"f32 max err {jnp.max(jnp.abs(out - ref))}")

    # 2) perf configuration: bf16 MXU operands (f32 accumulation / f32 softmax)
    #    + EUP approx reciprocal; checked at bf16-appropriate tolerance.
    out_bf16 = multi_head_attention(query, key_, value, params, n_heads=H,
                                    compute_dtype=jnp.bfloat16, approx_recip=True)
    out_bf16 = jax.block_until_ready(out_bf16)
    assert jnp.allclose(out_bf16, ref, atol=5e-2, rtol=5e-2), (
        f"bf16 max err {jnp.max(jnp.abs(out_bf16 - ref))}")

    print("KERNEL_OK")
</pallas_src>

<mosaic_0001>
module attributes {stable_mosaic.version = 11 : i64} {
  func.func @mha_kernel(%arg0: i32, %arg1: memref<16x32xf32, #tpu.memory_space<vmem>>, %arg2: memref<16x32xf32, #tpu.memory_space<vmem>>, %arg3: memref<16x32xf32, #tpu.memory_space<vmem>>, %arg4: memref<32x32xf32, #tpu.memory_space<vmem>>, %arg5: memref<1x32xf32, #tpu.memory_space<vmem>>, %arg6: memref<32x32xf32, #tpu.memory_space<vmem>>, %arg7: memref<1x32xf32, #tpu.memory_space<vmem>>, %arg8: memref<32x32xf32, #tpu.memory_space<vmem>>, %arg9: memref<1x32xf32, #tpu.memory_space<vmem>>, %arg10: memref<4x8x32xf32, #tpu.memory_space<vmem>>, %arg11: memref<1x32xf32, #tpu.memory_space<vmem>>, %arg12: memref<16x32xf32, #tpu.memory_space<vmem>>) attributes {dimension_semantics = [#tpu.dimension_semantics<parallel>], iteration_bounds = array<i64: 1>, scalar_prefetch = 0 : i64, scratch_operands = 0 : i64, tpu.core_type = #tpu.core_type<tc>, window_params = [{transform_indices = @transform_0, window_bounds = array<i64: 16, 32>}, {transform_indices = @transform_1, window_bounds = array<i64: 16, 32>}, {transform_indices = @transform_2, window_bounds = array<i64: 16, 32>}, {pipeline_mode = #tpu.pipeline_mode<synchronous>, transform_indices = @transform_3, window_bounds = array<i64: 32, 32>}, {pipeline_mode = #tpu.pipeline_mode<synchronous>, transform_indices = @transform_4, window_bounds = array<i64: 1, 32>}, {pipeline_mode = #tpu.pipeline_mode<synchronous>, transform_indices = @transform_5, window_bounds = array<i64: 32, 32>}, {pipeline_mode = #tpu.pipeline_mode<synchronous>, transform_indices = @transform_6, window_bounds = array<i64: 1, 32>}, {pipeline_mode = #tpu.pipeline_mode<synchronous>, transform_indices = @transform_7, window_bounds = array<i64: 32, 32>}, {pipeline_mode = #tpu.pipeline_mode<synchronous>, transform_indices = @transform_8, window_bounds = array<i64: 1, 32>}, {pipeline_mode = #tpu.pipeline_mode<synchronous>, transform_indices = @transform_9, window_bounds = array<i64: 4, 8, 32>}, {pipeline_mode = #tpu.pipeline_mode<synchronous>, transform_indices = @transform_10, window_bounds = array<i64: 1, 32>}, {transform_indices = @transform_11, window_bounds = array<i64: 16, 32>}]} {
    %c0 = arith.constant 0 : index
    %c0_0 = arith.constant 0 : index
    %0 = vector.load %arg1[%c0, %c0_0] : memref<16x32xf32, #tpu.memory_space<vmem>>, vector<16x32xf32>
    %c0_1 = arith.constant 0 : index
    %c0_2 = arith.constant 0 : index
    %1 = vector.load %arg4[%c0_1, %c0_2] : memref<32x32xf32, #tpu.memory_space<vmem>>, vector<32x32xf32>
    %cst = arith.constant dense<0.000000e+00> : vector<16x32xf32>
    %2 = tpu.matmul %0, %1, %cst {dimension_numbers = #tpu.dot_dimension_numbers<[1], [0], [0], [1], [0, 0, 1, 1], [], []>} : vector<16x32xf32>, vector<32x32xf32>, vector<16x32xf32> -> vector<16x32xf32>
    %c0_3 = arith.constant 0 : index
    %c0_4 = arith.constant 0 : index
    %3 = vector.load %arg5[%c0_3, %c0_4] : memref<1x32xf32, #tpu.memory_space<vmem>>, vector<1x32xf32>
    %4 = vector.broadcast %3 : vector<1x32xf32> to vector<16x32xf32>
    %5 = arith.addf %2, %4 : vector<16x32xf32>
    %c0_5 = arith.constant 0 : index
    %c0_6 = arith.constant 0 : index
    %6 = vector.load %arg2[%c0_5, %c0_6] : memref<16x32xf32, #tpu.memory_space<vmem>>, vector<16x32xf32>
    %c0_7 = arith.constant 0 : index
    %c0_8 = arith.constant 0 : index
    %7 = vector.load %arg6[%c0_7, %c0_8] : memref<32x32xf32, #tpu.memory_space<vmem>>, vector<32x32xf32>
    %cst_9 = arith.constant dense<0.000000e+00> : vector<16x32xf32>
    %8 = tpu.matmul %6, %7, %cst_9 {dimension_numbers = #tpu.dot_dimension_numbers<[1], [0], [0], [1], [0, 0, 1, 1], [], []>} : vector<16x32xf32>, vector<32x32xf32>, vector<16x32xf32> -> vector<16x32xf32>
    %c0_10 = arith.constant 0 : index
    %c0_11 = arith.constant 0 : index
    %9 = vector.load %arg7[%c0_10, %c0_11] : memref<1x32xf32, #tpu.memory_space<vmem>>, vector<1x32xf32>
    %10 = vector.broadcast %9 : vector<1x32xf32> to vector<16x32xf32>
    %11 = arith.addf %8, %10 : vector<16x32xf32>
    %c0_12 = arith.constant 0 : index
    %c0_13 = arith.constant 0 : index
    %12 = vector.load %arg3[%c0_12, %c0_13] : memref<16x32xf32, #tpu.memory_space<vmem>>, vector<16x32xf32>
    %c0_14 = arith.constant 0 : index
    %c0_15 = arith.constant 0 : index
    %13 = vector.load %arg8[%c0_14, %c0_15] : memref<32x32xf32, #tpu.memory_space<vmem>>, vector<32x32xf32>
    %cst_16 = arith.constant dense<0.000000e+00> : vector<16x32xf32>
    %14 = tpu.matmul %12, %13, %cst_16 {dimension_numbers = #tpu.dot_dimension_numbers<[1], [0], [0], [1], [0, 0, 1, 1], [], []>} : vector<16x32xf32>, vector<32x32xf32>, vector<16x32xf32> -> vector<16x32xf32>
    %c0_17 = arith.constant 0 : index
    %c0_18 = arith.constant 0 : index
    %15 = vector.load %arg9[%c0_17, %c0_18] : memref<1x32xf32, #tpu.memory_space<vmem>>, vector<1x32xf32>
    %16 = vector.broadcast %15 : vector<1x32xf32> to vector<16x32xf32>
    %17 = arith.addf %14, %16 : vector<16x32xf32>
    %cst_19 = arith.constant 0.176776692 : f32
    %18 = vector.broadcast %cst_19 : f32 to vector<16x32xf32>
    %19 = arith.mulf %5, %18 : vector<16x32xf32>
    %20 = vector.extract_strided_slice %19 {offsets = [0, 0], sizes = [8, 8], strides = [1, 1]} : vector<16x32xf32> to vector<8x8xf32>
    %21 = vector.extract_strided_slice %19 {offsets = [0, 8], sizes = [8, 8], strides = [1, 1]} : vector<16x32xf32> to vector<8x8xf32>
    %22 = vector.extract_strided_slice %19 {offsets = [0, 16], sizes = [8, 8], strides = [1, 1]} : vector<16x32xf32> to vector<8x8xf32>
    %23 = vector.extract_strided_slice %19 {offsets = [0, 24], sizes = [8, 8], strides = [1, 1]} : vector<16x32xf32> to vector<8x8xf32>
    %24 = vector.extract_strided_slice %19 {offsets = [8, 0], sizes = [8, 8], strides = [1, 1]} : vector<16x32xf32> to vector<8x8xf32>
    %25 = vector.extract_strided_slice %19 {offsets = [8, 8], sizes = [8, 8], strides = [1, 1]} : vector<16x32xf32> to vector<8x8xf32>
    %26 = vector.extract_strided_slice %19 {offsets = [8, 16], sizes = [8, 8], strides = [1, 1]} : vector<16x32xf32> to vector<8x8xf32>
    %27 = vector.extract_strided_slice %19 {offsets = [8, 24], sizes = [8, 8], strides = [1, 1]} : vector<16x32xf32> to vector<8x8xf32>
    %28 = vector.shape_cast %20 : vector<8x8xf32> to vector<1x8x8xf32>
    %29 = vector.shape_cast %21 : vector<8x8xf32> to vector<1x8x8xf32>
    %30 = vector.shape_cast %22 : vector<8x8xf32> to vector<1x8x8xf32>
    %31 = vector.shape_cast %23 : vector<8x8xf32> to vector<1x8x8xf32>
    %32 = vector.shape_cast %24 : vector<8x8xf32> to vector<1x8x8xf32>
    %33 = vector.shape_cast %25 : vector<8x8xf32> to vector<1x8x8xf32>
    %34 = vector.shape_cast %26 : vector<8x8xf32> to vector<1x8x8xf32>
    %35 = vector.shape_cast %27 : vector<8x8xf32> to vector<1x8x8xf32>
    %36 = tpu.concatenate %28, %29, %30, %31, %32, %33, %34, %35 in 0 : vector<1x8x8xf32>, vector<1x8x8xf32>, vector<1x8x8xf32>, vector<1x8x8xf32>, vector<1x8x8xf32>, vector<1x8x8xf32>, vector<1x8x8xf32>, vector<1x8x8xf32> -> vector<8x8x8xf32>
    %37 = vector.extract_strided_slice %11 {offsets = [0, 0], sizes = [8, 8], strides = [1, 1]} : vector<16x32xf32> to vector<8x8xf32>
    %38 = vector.extract_strided_slice %11 {offsets = [0, 8], sizes = [8, 8], strides = [1, 1]} : vector<16x32xf32> to vector<8x8xf32>
    %39 = vector.extract_strided_slice %11 {offsets = [0, 16], sizes = [8, 8], strides = [1, 1]} : vector<16x32xf32> to vector<8x8xf32>
    %40 = vector.extract_strided_slice %11 {offsets = [0, 24], sizes = [8, 8], strides = [1, 1]} : vector<16x32xf32> to vector<8x8xf32>
    %41 = vector.extract_strided_slice %11 {offsets = [8, 0], sizes = [8, 8], strides = [1, 1]} : vector<16x32xf32> to vector<8x8xf32>
    %42 = vector.extract_strided_slice %11 {offsets = [8, 8], sizes = [8, 8], strides = [1, 1]} : vector<16x32xf32> to vector<8x8xf32>
    %43 = vector.extract_strided_slice %11 {offsets = [8, 16], sizes = [8, 8], strides = [1, 1]} : vector<16x32xf32> to vector<8x8xf32>
    %44 = vector.extract_strided_slice %11 {offsets = [8, 24], sizes = [8, 8], strides = [1, 1]} : vector<16x32xf32> to vector<8x8xf32>
    %45 = vector.shape_cast %37 : vector<8x8xf32> to vector<1x8x8xf32>
    %46 = vector.shape_cast %38 : vector<8x8xf32> to vector<1x8x8xf32>
    %47 = vector.shape_cast %39 : vector<8x8xf32> to vector<1x8x8xf32>
    %48 = vector.shape_cast %40 : vector<8x8xf32> to vector<1x8x8xf32>
    %49 = vector.shape_cast %41 : vector<8x8xf32> to vector<1x8x8xf32>
    %50 = vector.shape_cast %42 : vector<8x8xf32> to vector<1x8x8xf32>
    %51 = vector.shape_cast %43 : vector<8x8xf32> to vector<1x8x8xf32>
    %52 = vector.shape_cast %44 : vector<8x8xf32> to vector<1x8x8xf32>
    %53 = tpu.concatenate %45, %46, %47, %48, %49, %50, %51, %52 in 0 : vector<1x8x8xf32>, vector<1x8x8xf32>, vector<1x8x8xf32>, vector<1x8x8xf32>, vector<1x8x8xf32>, vector<1x8x8xf32>, vector<1x8x8xf32>, vector<1x8x8xf32> -> vector<8x8x8xf32>
    %54 = vector.extract_strided_slice %17 {offsets = [0, 0], sizes = [8, 8], strides = [1, 1]} : vector<16x32xf32> to vector<8x8xf32>
    %55 = vector.extract_strided_slice %17 {offsets = [0, 8], sizes = [8, 8], strides = [1, 1]} : vector<16x32xf32> to vector<8x8xf32>
    %56 = vector.extract_strided_slice %17 {offsets = [0, 16], sizes = [8, 8], strides = [1, 1]} : vector<16x32xf32> to vector<8x8xf32>
    %57 = vector.extract_strided_slice %17 {offsets = [0, 24], sizes = [8, 8], strides = [1, 1]} : vector<16x32xf32> to vector<8x8xf32>
    %58 = vector.extract_strided_slice %17 {offsets = [8, 0], sizes = [8, 8], strides = [1, 1]} : vector<16x32xf32> to vector<8x8xf32>
    %59 = vector.extract_strided_slice %17 {offsets = [8, 8], sizes = [8, 8], strides = [1, 1]} : vector<16x32xf32> to vector<8x8xf32>
    %60 = vector.extract_strided_slice %17 {offsets = [8, 16], sizes = [8, 8], strides = [1, 1]} : vector<16x32xf32> to vector<8x8xf32>
    %61 = vector.extract_strided_slice %17 {offsets = [8, 24], sizes = [8, 8], strides = [1, 1]} : vector<16x32xf32> to vector<8x8xf32>
    %62 = vector.shape_cast %54 : vector<8x8xf32> to vector<1x8x8xf32>
    %63 = vector.shape_cast %55 : vector<8x8xf32> to vector<1x8x8xf32>
    %64 = vector.shape_cast %56 : vector<8x8xf32> to vector<1x8x8xf32>
    %65 = vector.shape_cast %57 : vector<8x8xf32> to vector<1x8x8xf32>
    %66 = vector.shape_cast %58 : vector<8x8xf32> to vector<1x8x8xf32>
    %67 = vector.shape_cast %59 : vector<8x8xf32> to vector<1x8x8xf32>
    %68 = vector.shape_cast %60 : vector<8x8xf32> to vector<1x8x8xf32>
    %69 = vector.shape_cast %61 : vector<8x8xf32> to vector<1x8x8xf32>
    %70 = tpu.concatenate %62, %63, %64, %65, %66, %67, %68, %69 in 0 : vector<1x8x8xf32>, vector<1x8x8xf32>, vector<1x8x8xf32>, vector<1x8x8xf32>, vector<1x8x8xf32>, vector<1x8x8xf32>, vector<1x8x8xf32>, vector<1x8x8xf32> -> vector<8x8x8xf32>
    "tpu.trace_start"() <{level = 10 : i32, message = "gqd,gkd->gqk"}> : () -> ()
    %cst_20 = arith.constant dense<0.000000e+00> : vector<8x8x8xf32>
    %71 = tpu.matmul %36, %53, %cst_20 {dimension_numbers = #tpu.dot_dimension_numbers<[2], [2], [1], [1], [0, 0, 0, 1, 1, 1], [0], [0]>} : vector<8x8x8xf32>, vector<8x8x8xf32>, vector<8x8x8xf32> -> vector<8x8x8xf32>
    "tpu.trace_stop"() : () -> ()
    %cst_21 = arith.constant dense<0xFF800000> : vector<8x8xf32>
    %72 = vector.multi_reduction <maximumf>, %71, %cst_21 [2] : vector<8x8x8xf32> to vector<8x8xf32>
    %73 = vector.shape_cast %72 : vector<8x8xf32> to vector<8x8x1xf32>
    %74 = vector.broadcast %73 : vector<8x8x1xf32> to vector<8x8x8xf32>
    %75 = arith.subf %71, %74 : vector<8x8x8xf32>
    %76 = math.exp %75 : vector<8x8x8xf32>
    %cst_22 = arith.constant dense<0.000000e+00> : vector<8x8xf32>
    %77 = vector.multi_reduction <add>, %76, %cst_22 [2] : vector<8x8x8xf32> to vector<8x8xf32>
    %78 = vector.shape_cast %77 : vector<8x8xf32> to vector<8x8x1xf32>
    %79 = vector.broadcast %78 : vector<8x8x1xf32> to vector<8x8x8xf32>
    %80 = arith.divf %76, %79 : vector<8x8x8xf32>
    "tpu.trace_start"() <{level = 10 : i32, message = "gqk,gkd->gqd"}> : () -> ()
    %cst_23 = arith.constant dense<0.000000e+00> : vector<8x8x8xf32>
    %81 = tpu.matmul %80, %70, %cst_23 {dimension_numbers = #tpu.dot_dimension_numbers<[2], [1], [1], [2], [0, 0, 0, 1, 1, 2], [0], [0]>} : vector<8x8x8xf32>, vector<8x8x8xf32>, vector<8x8x8xf32> -> vector<8x8x8xf32>
    "tpu.trace_stop"() : () -> ()
    %c0_24 = arith.constant 0 : index
    %c0_25 = arith.constant 0 : index
    %c0_26 = arith.constant 0 : index
    %82 = vector.load %arg10[%c0_24, %c0_25, %c0_26] : memref<4x8x32xf32, #tpu.memory_space<vmem>>, vector<4x8x32xf32>
    %83 = vector.extract_strided_slice %81 {offsets = [0, 0, 0], sizes = [4, 8, 8], strides = [1, 1, 1]} : vector<8x8x8xf32> to vector<4x8x8xf32>
    "tpu.trace_start"() <{level = 10 : i32, message = "hqd,hde->hqe"}> : () -> ()
    %cst_27 = arith.constant dense<0.000000e+00> : vector<4x8x32xf32>
    %84 = tpu.matmul %83, %82, %cst_27 {dimension_numbers = #tpu.dot_dimension_numbers<[2], [1], [1], [2], [0, 0, 0, 1, 1, 2], [0], [0]>} : vector<4x8x8xf32>, vector<4x8x32xf32>, vector<4x8x32xf32> -> vector<4x8x32xf32>
    "tpu.trace_stop"() : () -> ()
    %c0_28 = arith.constant 0 : index
    %c0_29 = arith.constant 0 : index
    %85 = vector.load %arg11[%c0_28, %c0_29] : memref<1x32xf32, #tpu.memory_space<vmem>>, vector<1x32xf32>
    %86 = vector.extract_strided_slice %84 {offsets = [0, 0, 0], sizes = [1, 8, 32], strides = [1, 1, 1]} : vector<4x8x32xf32> to vector<1x8x32xf32>
    %87 = vector.shape_cast %86 : vector<1x8x32xf32> to vector<8x32xf32>
    %88 = vector.broadcast %85 : vector<1x32xf32> to vector<8x32xf32>
    %89 = arith.addf %88, %87 : vector<8x32xf32>
    %90 = vector.extract_strided_slice %84 {offsets = [1, 0, 0], sizes = [1, 8, 32], strides = [1, 1, 1]} : vector<4x8x32xf32> to vector<1x8x32xf32>
    %91 = vector.shape_cast %90 : vector<1x8x32xf32> to vector<8x32xf32>
    %92 = arith.addf %89, %91 : vector<8x32xf32>
    %93 = vector.extract_strided_slice %84 {offsets = [2, 0, 0], sizes = [1, 8, 32], strides = [1, 1, 1]} : vector<4x8x32xf32> to vector<1x8x32xf32>
    %94 = vector.shape_cast %93 : vector<1x8x32xf32> to vector<8x32xf32>
    %95 = arith.addf %92, %94 : vector<8x32xf32>
    %96 = vector.extract_strided_slice %84 {offsets = [3, 0, 0], sizes = [1, 8, 32], strides = [1, 1, 1]} : vector<4x8x32xf32> to vector<1x8x32xf32>
    %97 = vector.shape_cast %96 : vector<1x8x32xf32> to vector<8x32xf32>
    %98 = arith.addf %95, %97 : vector<8x32xf32>
    %c0_30 = arith.constant 0 : index
    %c0_31 = arith.constant 0 : index
    %99 = vector.load %arg12[%c0_30, %c0_31] : memref<16x32xf32, #tpu.memory_space<vmem>>, vector<8x32xf32>
    tpu.vector_store %arg12[%c0_30, %c0_31], %98 {strides = array<i32>} : memref<16x32xf32, #tpu.memory_space<vmem>>, vector<8x32xf32>,
    %100 = vector.extract_strided_slice %81 {offsets = [4, 0, 0], sizes = [4, 8, 8], strides = [1, 1, 1]} : vector<8x8x8xf32> to vector<4x8x8xf32>
    "tpu.trace_start"() <{level = 10 : i32, message = "hqd,hde->hqe"}> : () -> ()
    %cst_32 = arith.constant dense<0.000000e+00> : vector<4x8x32xf32>
    %101 = tpu.matmul %100, %82, %cst_32 {dimension_numbers = #tpu.dot_dimension_numbers<[2], [1], [1], [2], [0, 0, 0, 1, 1, 2], [0], [0]>} : vector<4x8x8xf32>, vector<4x8x32xf32>, vector<4x8x32xf32> -> vector<4x8x32xf32>
    "tpu.trace_stop"() : () -> ()
    %c0_33 = arith.constant 0 : index
    %c0_34 = arith.constant 0 : index
    %102 = vector.load %arg11[%c0_33, %c0_34] : memref<1x32xf32, #tpu.memory_space<vmem>>, vector<1x32xf32>
    %103 = vector.extract_strided_slice %101 {offsets = [0, 0, 0], sizes = [1, 8, 32], strides = [1, 1, 1]} : vector<4x8x32xf32> to vector<1x8x32xf32>
    %104 = vector.shape_cast %103 : vector<1x8x32xf32> to vector<8x32xf32>
    %105 = vector.broadcast %102 : vector<1x32xf32> to vector<8x32xf32>
    %106 = arith.addf %105, %104 : vector<8x32xf32>
    %107 = vector.extract_strided_slice %101 {offsets = [1, 0, 0], sizes = [1, 8, 32], strides = [1, 1, 1]} : vector<4x8x32xf32> to vector<1x8x32xf32>
    %108 = vector.shape_cast %107 : vector<1x8x32xf32> to vector<8x32xf32>
    %109 = arith.addf %106, %108 : vector<8x32xf32>
    %110 = vector.extract_strided_slice %101 {offsets = [2, 0, 0], sizes = [1, 8, 32], strides = [1, 1, 1]} : vector<4x8x32xf32> to vector<1x8x32xf32>
    %111 = vector.shape_cast %110 : vector<1x8x32xf32> to vector<8x32xf32>
    %112 = arith.addf %109, %111 : vector<8x32xf32>
    %113 = vector.extract_strided_slice %101 {offsets = [3, 0, 0], sizes = [1, 8, 32], strides = [1, 1, 1]} : vector<4x8x32xf32> to vector<1x8x32xf32>
    %114 = vector.shape_cast %113 : vector<1x8x32xf32> to vector<8x32xf32>
    %115 = arith.addf %112, %114 : vector<8x32xf32>
    %c8 = arith.constant 8 : index
    %c0_35 = arith.constant 0 : index
    %116 = vector.load %arg12[%c8, %c0_35] : memref<16x32xf32, #tpu.memory_space<vmem>>, vector<8x32xf32>
    tpu.vector_store %arg12[%c8, %c0_35], %115 {strides = array<i32>} : memref<16x32xf32, #tpu.memory_space<vmem>>, vector<8x32xf32>,
    return
  }
  func.func @transform_0(%arg0: i32) -> (i32, i32) {
    %c0_i32 = arith.constant 0 : i32
    %c0_i32_0 = arith.constant 0 : i32
    return %arg0, %c0_i32 : i32, i32
  }
  func.func @transform_1(%arg0: i32) -> (i32, i32) {
    %c0_i32 = arith.constant 0 : i32
    %c0_i32_0 = arith.constant 0 : i32
    return %arg0, %c0_i32 : i32, i32
  }
  func.func @transform_2(%arg0: i32) -> (i32, i32) {
    %c0_i32 = arith.constant 0 : i32
    %c0_i32_0 = arith.constant 0 : i32
    return %arg0, %c0_i32 : i32, i32
  }
  func.func @transform_3(%arg0: i32) -> (i32, i32) {
    %c0_i32 = arith.constant 0 : i32
    %c0_i32_0 = arith.constant 0 : i32
    %c0_i32_1 = arith.constant 0 : i32
    return %c0_i32, %c0_i32_0 : i32, i32
  }
  func.func @transform_4(%arg0: i32) -> (i32, i32) {
    %c0_i32 = arith.constant 0 : i32
    %c0_i32_0 = arith.constant 0 : i32
    %c0_i32_1 = arith.constant 0 : i32
    return %c0_i32, %c0_i32_0 : i32, i32
  }
  func.func @transform_5(%arg0: i32) -> (i32, i32) {
    %c0_i32 = arith.constant 0 : i32
    %c0_i32_0 = arith.constant 0 : i32
    %c0_i32_1 = arith.constant 0 : i32
    return %c0_i32, %c0_i32_0 : i32, i32
  }
  func.func @transform_6(%arg0: i32) -> (i32, i32) {
    %c0_i32 = arith.constant 0 : i32
    %c0_i32_0 = arith.constant 0 : i32
    %c0_i32_1 = arith.constant 0 : i32
    return %c0_i32, %c0_i32_0 : i32, i32
  }
  func.func @transform_7(%arg0: i32) -> (i32, i32) {
    %c0_i32 = arith.constant 0 : i32
    %c0_i32_0 = arith.constant 0 : i32
    %c0_i32_1 = arith.constant 0 : i32
    return %c0_i32, %c0_i32_0 : i32, i32
  }
  func.func @transform_8(%arg0: i32) -> (i32, i32) {
    %c0_i32 = arith.constant 0 : i32
    %c0_i32_0 = arith.constant 0 : i32
    %c0_i32_1 = arith.constant 0 : i32
    return %c0_i32, %c0_i32_0 : i32, i32
  }
  func.func @transform_9(%arg0: i32) -> (i32, i32, i32) {
    %c0_i32 = arith.constant 0 : i32
    %c0_i32_0 = arith.constant 0 : i32
    %c0_i32_1 = arith.constant 0 : i32
    %c0_i32_2 = arith.constant 0 : i32
    return %c0_i32, %c0_i32_0, %c0_i32_1 : i32, i32, i32
  }
  func.func @transform_10(%arg0: i32) -> (i32, i32) {
    %c0_i32 = arith.constant 0 : i32
    %c0_i32_0 = arith.constant 0 : i32
    %c0_i32_1 = arith.constant 0 : i32
    return %c0_i32, %c0_i32_0 : i32, i32
  }
  func.func @transform_11(%arg0: i32) -> (i32, i32) {
    %c0_i32 = arith.constant 0 : i32
    %c0_i32_0 = arith.constant 0 : i32
    return %arg0, %c0_i32 : i32, i32
  }
}

</mosaic_0001>

<bundles_post_ra>
// kernel: tpu_custom_call.1
= control target key start
LH: loop header
LB: loop body
LE: loop exit
PB: predicated region body
PF: predicated region fallthrough
CT: control target
= control target key end

     0   :  { %16 = vsyncpa [#allocation3], 0  ;;  %s3299_s0 = inlined_call_operand.hbm [shape: f32[16,32], index: 0, kind: input, shape index: {}]   ;;  %s3300_s1 = inlined_call_operand.hbm [shape: f32[16,32], index: 1, kind: input, shape index: {}]   ;;  %s3301_s2 = inlined_call_operand.hbm [shape: f32[16,32], index: 2, kind: input, shape index: {}]   ;;  %s3302_s3 = inlined_call_operand.hbm [shape: f32[32,32], index: 3, kind: input, shape index: {}]   ;;  %s3303_s4 = inlined_call_operand.vmem [shape: f32[1,32], index: 4, kind: input, shape index: {}]   ;;  %s3304_s5 = inlined_call_operand.hbm [shape: f32[32,32], index: 5, kind: input, shape index: {}]   ;;  %s3305_s6 = inlined_call_operand.vmem [shape: f32[1,32], index: 6, kind: input, shape index: {}]   ;;  %s3306_s7 = inlined_call_operand.hbm [shape: f32[32,32], index: 7, kind: input, shape index: {}]   ;;  %s3307_s8 = inlined_call_operand.hbm [shape: f32[1,32], index: 8, kind: input, shape index: {}]   ;;  %s3308_s9 = inlined_call_operand.vmem [shape: f32[4,8,32], index: 9, kind: input, shape index: {}]   ;;  %s3309_s10 = inlined_call_operand.vmem [shape: f32[1,32], index: 10, kind: input, shape index: {}]   ;;  %s3310_s11 = inlined_call_operand.hbm [shape: f32[16,32], index: 11, kind: output, shape index: {}]  }
   0x1   :  { %17 = vsyncpa [#allocation6], 0 }
   0x2   :  { %18 = vsyncpa [#allocation9], 0 }
   0x3   :  { %19 = vsyncpa [#allocation12], 0 }
   0x4   :  { %20 = vsyncpa [#allocation4], 0  ;;  %s2895_s17 = smov [#allocation5]   ;;  %s2896_s19 = smov [#allocation8]  }
   0x5   :  { %s38_s18 = sshll.u32 %s2895_s17, 4  ;;  %s62_s20 = sshll.u32 %s2896_s19, 4  ;;  %s39_s18 = int_to_ptr.vmem [resolvable:$true] %s38_s18  ;;  %s2970_s20 = int_to_ptr.vmem [resolvable:$true] %s62_s20 }
   0x6   :  { %s2709_s23 = scalar_lea.hbm %s3300_s1, 256 }
   0x7   :  { %p2710_p0 = scmp.ne.s32.totalorder %s3300_s1, %s2709_s23  ;;  %p2713_p1 = scmp.lt.u32.totalorder %s2709_s23, %s3300_s1 }
   0x9   :  { %p2715_p2 = pnand %p2713_p1, %p2710_p0 }
   0xb   :  { %2718 = shalt.err (!%p2715_p2)
}
   0xc   :  { %s2719_s28 = scalar_lea.vmem %s39_s18, 256  ;;  %p2724_p4 = scmp.lt.s32.totalorder %s39_s18, %s39_s18 }
   0xd   :  { %p2720_p3 = scmp.ne.s32.totalorder %s39_s18, %s2719_s28  ;;  %p2725_p5 = scmp.lt.s32.totalorder %s2719_s28, %s2719_s28 }
   0xf   :  { %p2726_p6 = por %p2725_p5, %p2724_p4 }
  0x11   :  { %p2727_p7 = pnand %p2726_p6, %p2720_p3 }
  0x13   :  { %2730 = shalt.err (!%p2727_p7)
}
  0x14   :  { %s2897_s29 = smov 128   ;;  %s2898_s30 = smov 8  }
  0x15   :  { %44 = dma.hbm_to_vmem [thread:$0]  %s3300_s1, 256, %s39_s18, [#allocation6], %s2897_s29, %s2897_s29, %s2898_s30  }
  0x16   :  { %s2731_s16 = scalar_lea.hbm %s3302_s3, 512 }
  0x17   :  { %p2732_p8 = scmp.ne.s32.totalorder %s3302_s3, %s2731_s16  ;;  %p2735_p9 = scmp.lt.u32.totalorder %s2731_s16, %s3302_s3 }
  0x19   :  { %p2737_p10 = pnand %p2735_p9, %p2732_p8 }
  0x1b   :  { %2740 = shalt.err (!%p2737_p10)
}
  0x1c   :  { %s2741_s23 = scalar_lea.vmem %s2970_s20, 512  ;;  %p2746_p12 = scmp.lt.s32.totalorder %s2970_s20, %s2970_s20 }
  0x1d   :  { %p2742_p11 = scmp.ne.s32.totalorder %s2970_s20, %s2741_s23  ;;  %p2747_p13 = scmp.lt.s32.totalorder %s2741_s23, %s2741_s23 }
  0x1f   :  { %p2748_p0 = por %p2747_p13, %p2746_p12 }
  0x21   :  { %p2749_p1 = pnand %p2748_p0, %p2742_p11 }
  0x23   :  { %2752 = shalt.err (!%p2749_p1)
}
  0x24   :  { %68 = dma.hbm_to_vmem [thread:$0]  %s3302_s3, 512, %s2970_s20, [#allocation9], %s2897_s29, %s2897_s29, %s2898_s30  }
  0x25   :  { %s2899_s24 = smov [#allocation11]   ;;  %s2900_s26 = smov [#allocation2]  }
  0x26   :  { %s90_s25 = sshll.u32 %s2899_s24, 4  ;;  %s26_s27 = sshll.u32 %s2900_s26, 4  ;;  %s91_s25 = int_to_ptr.vmem [resolvable:$true] %s90_s25  ;;  %s3007_s27 = int_to_ptr.vmem [resolvable:$true] %s26_s27 }
  0x27   :  { %s2753_s13 = scalar_lea.hbm %s3306_s7, 512 }
  0x28   :  { %p2754_p2 = scmp.ne.s32.totalorder %s3306_s7, %s2753_s13  ;;  %p2757_p3 = scmp.lt.u32.totalorder %s2753_s13, %s3306_s7 }
  0x2a   :  { %p2759_p4 = pnand %p2757_p3, %p2754_p2 }
  0x2c   :  { %2762 = shalt.err (!%p2759_p4)
}
  0x2d   :  { %s2763_s3 = scalar_lea.vmem %s91_s25, 512  ;;  %p2768_p6 = scmp.lt.s32.totalorder %s91_s25, %s91_s25 }
  0x2e   :  { %p2764_p5 = scmp.ne.s32.totalorder %s91_s25, %s2763_s3  ;;  %p2769_p7 = scmp.lt.s32.totalorder %s2763_s3, %s2763_s3 }
  0x30   :  { %p2770_p8 = por %p2769_p7, %p2768_p6 }
  0x32   :  { %p2771_p9 = pnand %p2770_p8, %p2764_p5 }
  0x34   :  { %2774 = shalt.err (!%p2771_p9)
}
  0x35   :  { %96 = dma.hbm_to_vmem [thread:$0]  %s3306_s7, 512, %s91_s25, [#allocation12], %s2897_s29, %s2897_s29, %s2898_s30  }
  0x36   :  { %s2775_s23 = scalar_lea.hbm %s3299_s0, 256 }
  0x37   :  { %p2776_p10 = scmp.ne.s32.totalorder %s3299_s0, %s2775_s23  ;;  %p2779_p11 = scmp.lt.u32.totalorder %s2775_s23, %s3299_s0 }
  0x39   :  { %p2781_p12 = pnand %p2779_p11, %p2776_p10 }
  0x3b   :  { %2784 = shalt.err (!%p2781_p12)
}
  0x3c   :  { %s2785_s28 = scalar_lea.vmem %s3007_s27, 256  ;;  %p2790_p0 = scmp.lt.s32.totalorder %s3007_s27, %s3007_s27 }
  0x3d   :  { %p2786_p13 = scmp.ne.s32.totalorder %s3007_s27, %s2785_s28  ;;  %p2791_p1 = scmp.lt.s32.totalorder %s2785_s28, %s2785_s28 }
  0x3f   :  { %p2792_p2 = por %p2791_p1, %p2790_p0 }
  0x41   :  { %p2793_p3 = pnand %p2792_p2, %p2786_p13 }
  0x43   :  { %2796 = shalt.err (!%p2793_p3)
}
  0x44   :  { %32 = dma.hbm_to_vmem [thread:$0]  %s3299_s0, 256, %s3007_s27, [#allocation3], %s2897_s29, %s2897_s29, %s2898_s30  }
  0x45   :  { %s2901_s12 = smov [#allocation7]   ;;  %s2902_s14 = smov [#allocation10]  }
  0x46   :  { %s50_s13 = sshll.u32 %s2901_s12, 4  ;;  %s76_s15 = sshll.u32 %s2902_s14, 4  ;;  %s51_s13 = int_to_ptr.vmem [resolvable:$true] %s50_s13  ;;  %s3044_s15 = int_to_ptr.vmem [resolvable:$true] %s76_s15 }
  0x47   :  { %s2797_s3 = scalar_lea.hbm %s3301_s2, 256 }
  0x48   :  { %p2798_p4 = scmp.ne.s32.totalorder %s3301_s2, %s2797_s3  ;;  %p2801_p5 = scmp.lt.u32.totalorder %s2797_s3, %s3301_s2 }
  0x4a   :  { %p2803_p6 = pnand %p2801_p5, %p2798_p4 }
  0x4c   :  { %2806 = shalt.err (!%p2803_p6)
}
  0x4d   :  { %s2807_s0 = scalar_lea.vmem %s51_s13, 256  ;;  %p2812_p8 = scmp.lt.s32.totalorder %s51_s13, %s51_s13 }
  0x4e   :  { %p2808_p7 = scmp.ne.s32.totalorder %s51_s13, %s2807_s0  ;;  %p2813_p9 = scmp.lt.s32.totalorder %s2807_s0, %s2807_s0 }
  0x50   :  { %p2814_p10 = por %p2813_p9, %p2812_p8 }
  0x52   :  { %p2815_p11 = pnand %p2814_p10, %p2808_p7 }
  0x54   :  { %2818 = shalt.err (!%p2815_p11)
}
  0x55   :  { %56 = dma.hbm_to_vmem [thread:$0]  %s3301_s2, 256, %s51_s13, [#allocation6], %s2897_s29, %s2897_s29, %s2898_s30  }
  0x56   :  { %s2819_s24 = scalar_lea.hbm %s3304_s5, 512 }
  0x57   :  { %p2820_p12 = scmp.ne.s32.totalorder %s3304_s5, %s2819_s24  ;;  %p2823_p13 = scmp.lt.u32.totalorder %s2819_s24, %s3304_s5 }
  0x59   :  { %p2825_p0 = pnand %p2823_p13, %p2820_p12 }
  0x5b   :  { %2828 = shalt.err (!%p2825_p0)
}
  0x5c   :  { %s2829_s12 = scalar_lea.vmem %s3044_s15, 512  ;;  %p2834_p2 = scmp.lt.s32.totalorder %s3044_s15, %s3044_s15 }
  0x5d   :  { %p2830_p1 = scmp.ne.s32.totalorder %s3044_s15, %s2829_s12  ;;  %p2835_p3 = scmp.lt.s32.totalorder %s2829_s12, %s2829_s12 }
  0x5f   :  { %p2836_p4 = por %p2835_p3, %p2834_p2 }
  0x61   :  { %p2837_p5 = pnand %p2836_p4, %p2830_p1 }
  0x63   :  { %2840 = shalt.err (!%p2837_p5)
}
  0x64   :  { %82 = dma.hbm_to_vmem [thread:$0]  %s3304_s5, 512, %s3044_s15, [#allocation9], %s2897_s29, %s2897_s29, %s2898_s30  }
  0x65   :  { %s2903_s14 = smov [#allocation13]   ;;  %s2841_s20 = scalar_lea.hbm %s3307_s8, 16 }
  0x66   :  { %s103_s16 = sshll.u32 %s2903_s14, 4  ;;  %p2842_p6 = scmp.ne.s32.totalorder %s3307_s8, %s2841_s20  ;;  %s104_s16 = int_to_ptr.vmem [resolvable:$true] %s103_s16 }
  0x67   :  { %p2845_p7 = scmp.lt.u32.totalorder %s2841_s20, %s3307_s8 }
  0x69   :  { %p2847_p8 = pnand %p2845_p7, %p2842_p6 }
  0x6b   :  { %2850 = shalt.err (!%p2847_p8)
}
  0x6c   :  { %s2851_s27 = scalar_lea.vmem %s104_s16, 16  ;;  %s2855_s5 = scalar_lea.vmem %s104_s16, 32 }
  0x6d   :  { %p2852_p9 = scmp.ne.s32.totalorder %s104_s16, %s2851_s27  ;;  %p2856_p10 = scmp.lt.s32.totalorder %s104_s16, %s104_s16 }
  0x6e   :  { %p2857_p11 = scmp.lt.s32.totalorder %s2855_s5, %s2851_s27 }
  0x70   :  { %p2858_p12 = por %p2857_p11, %p2856_p10 }
  0x72   :  { %p2859_p13 = pnand %p2858_p12, %p2852_p9 }
  0x74   :  { %2862 = shalt.err (!%p2859_p13)
}
  0x75   :  { %106 = dma.hbm_to_vmem [thread:$0]  %s3307_s8, 16, %s104_s16, [#allocation12]  }
  0x76   :  { %2885 = dma.done.wait [#allocation3], 256  }
  0x77   :  { %2886 = vsyncadd [#allocation3], 4294967040 }
  0x78   :  { %2887 = dma.done.wait [#allocation6], 512  }
  0x79   :  { %2888 = vsyncadd [#allocation6], 4294966784 }
  0x7a   :  { %2889 = dma.done.wait [#allocation9], 1024  }
  0x7b   :  { %2890 = vsyncadd [#allocation9], 4294966272 }
  0x7c   :  { %2891 = dma.done.wait [#allocation12], 528  }
  0x7d   :  { %2892 = vsyncadd [#allocation12], 4294966768  ;;  %v229_v0 = vld [vmem:[#allocation10] sm:$0xff]  ;;  %v230_v1 = vld [vmem:[#allocation10 + $0x8] sm:$0xff]  ;;  %vm145_vm0 = vcmask 261120   ;;  %v2904_v16 = vmov 0.0  }
  0x7e   :  { %v134_v2 = vld [vmem:[#allocation8] sm:$0xff]  ;;  %v2632_v3 = vpack.c.bf16 %v230_v1, %v229_v0  ;;  %v135_v4 = vld [vmem:[#allocation8 + $0x8] sm:$0xff]  ;;  %v231_v5 = vld [vmem:[#allocation10 + $0x10] sm:$0xff]  ;;  %vm2905_vm1 = vmmov 0   ;;  %vm465_vm2 = vcmask 64512   ;;  %s2906_s26 = smov 120  }
  0x7f   :  { %v232_v6 = vld [vmem:[#allocation10 + $0x18] sm:$0xff]  ;;  %v2624_v7 = vpack.c.bf16 %v135_v4, %v134_v2  ;;  %v136_v9 = vld [vmem:[#allocation8 + $0x10] sm:$0xff]  ;;  %v227_v11 = vld [vmem:[#allocation5] sm:$0xff]  ;;  %s2907_s28 = smov 112   ;;  %s2909_s3 = smov [#allocation14]  }
  0x80   :  { %v2636_v8 = vpack.c.bf16 %v232_v6, %v231_v5  ;;  %v137_v10 = vld [vmem:[#allocation8 + $0x18] sm:$0xff]  ;;  %2633 = vmatprep.subr.bf16.mxu1 %v2632_v3  ;;  %2490 = vmatprep.mubr.msk.f32.mxu1 %vm145_vm0, %v227_v11  ;;  %v132_v13 = vld [vmem:[#allocation2] sm:$0xff]  ;;  %v228_v14 = vld [vmem:[#allocation5 + $0x8] sm:$0xff]  ;;  %s2347_s20 = sshll.u32 %s2909_s3, 4  ;;  %s2348_s20 = int_to_ptr.vmem [resolvable:$true] %s2347_s20 }
  0x81   :  { %v2628_v12 = vpack.c.bf16 %v137_v10, %v136_v9  ;;  %2625 = vmatprep.subr.bf16.mxu0 %v2624_v7  ;;  %2635 = vmatpush3.bf16.msra.mxu1 %v2632_v3  ;;  %v133_v15 = vld [vmem:[#allocation2 + $0x8] sm:$0xff]  ;;  %v323_v17 = vld [vmem:[#allocation11] sm:$0xff]  ;;  %v324_v18 = vld [vmem:[#allocation11 + $0x8] sm:$0xff]  ;;  %s2863_s19 = scalar_lea.vmem %s2348_s20, 256  ;;  %p2868_p1 = scmp.lt.s32.totalorder %s2348_s20, %s2348_s20 }
  0x82   :  { %2627 = vmatpush3.bf16.msra.mxu0 %v2624_v7  ;;  %2637 = vmatprep.subr.bf16.mxu1 %v2636_v8  ;;  %v325_v19 = vld [vmem:[#allocation11 + $0x10] sm:$0xff]  ;;  %v2640_v20 = vpack.c.bf16 %v324_v18, %v323_v17  ;;  %v326_v21 = vld [vmem:[#allocation11 + $0x18] sm:$0xff]  ;;  %v2368_v49 = vld [vmem:[#allocation13] ss:$0 sm:$0xff]  ;;  %p2864_p0 = scmp.ne.s32.totalorder %s2348_s20, %s2863_s19  ;;  %p2869_p2 = scmp.lt.s32.totalorder %s2863_s19, %s2863_s19 }
  0x83   :  { %2629 = vmatprep.subr.bf16.mxu0 %v2628_v12  ;;  %2479 = vmatprep.mubr.msk.f32.mxu0 %vm145_vm0, %v132_v13  ;;  %v2644_v22 = vpack.c.bf16 %v326_v21, %v325_v19  ;;  %v321_v23 = vld [vmem:[#allocation7] sm:$0xff]  ;;  %v322_v24 = vld [vmem:[#allocation7 + $0x8] sm:$0xff] }
  0x84   :  { %v2365_v25 = vld [vmem:[%s3305_s6] ss:$0 sm:$0xff]  ;;  %p2870_p3 = por %p2869_p2, %p2868_p1 }
  0x85   :  { %2639 = vmatpush3.bf16.msra.mxu1 %v2636_v8  ;;  %v2362_v27 = vld [vmem:[%s3303_s4] ss:$0 sm:$0xff]  ;;  %s2908_s4 = smov 104  }
  0x86   :  { %2631 = vmatpush3.bf16.msra.mxu0 %v2628_v12  ;;  %2504 = vmatprep.subr.mxu1 %v2904_v16  ;;  %p2871_p4 = pnand %p2870_p3, %p2864_p0 }
  0x87   :  { %2641 = vmatprep.subr.bf16.mxu0 %v2640_v20 }
  0x88   :  { %2491 = vmatmul.mubr.msk.f32.vlgmr.msra.gmra.mrb[0].mxu1 %vm145_vm0, %v228_v14 }
  0x89   :  { %2480 = vmatmul.mubr.msk.f32.vlgmr.msra.gmra.mrb[0].mxu0 %vm145_vm0, %v133_v15  ;;  %2506 = vmatprep.mubr.msk.f32.mxu1 %vm2905_vm1, %v2904_v16 }
  0x8a   :  { %2643 = vmatpush3.bf16.msra.mxu0 %v2640_v20  ;;  %2501 = vmatprep.mubr.msk.f32.mxu0 %vm145_vm0, %v321_v23 }
  0x8b   :  { %2645 = vmatprep.subr.bf16.mxu0 %v2644_v22 }
  0x8e   :  { %2647 = vmatpush3.bf16.msra.mxu0 %v2644_v22 }
  0x8f   :  { %2514 = vmatprep.subr.mxu0 %v2904_v16 }
  0x91   :  { %2502 = vmatmul.mubr.msk.f32.vlgmr.msra.gmra.mrb[2].mxu0 %vm145_vm0, %v322_v24 }
  0x92   :  { %2516 = vmatprep.mubr.msk.f32.mxu0 %vm2905_vm1, %v2904_v16 }
 0x15b   :  { %v2492_v26 = vpop.f32.mrb[0].mxu1 }
 0x15c   :  { %v2481_v28 = vpop.f32.mrb[0].mxu0  ;;  %v312_v29 = vpop.f32.mrb[1].mxu1  ;;  %v318_v36 = vadd.f32 %v2492_v26, %v2365_v25 }
 0x15d   :  { %v313_v30 = vadd.f32 %v2365_v25, %v312_v29  ;;  %v218_v31 = vpop.f32.mrb[1].mxu0  ;;  %v224_v34 = vadd.f32 %v2481_v28, %v2362_v27 }
 0x15e   :  { %v219_v32 = vadd.f32 %v2362_v27, %v218_v31 }
 0x15f   :  { %432 = vrot.lane.b32.xlu1 %v313_v30, %s2906_s26  ;;  %434 = vrot.lane.b32.xlu0 %v313_v30, %s2907_s28  ;;  %v416_v35 = vmul.f32 0.17677669, %v224_v34 }
 0x160   :  { %v415_v33 = vmul.f32 0.17677669, %v219_v32  ;;  %2505 = vmatpush3.xpose.msk.msra.mxu1 %vm465_vm2, %v313_v30 }
 0x161   :  { %2509 = vmatprep.subr.mxu1 %v2904_v16 }
 0x163   :  { %2507 = vmatmul.mubr.msk.f32.vlgmr.msra.gmra.mrb[2].mxu1 %vm465_vm2, %v415_v33  ;;  %418 = vrot.lane.b32.xlu1 %v415_v33, %s2906_s26 }
 0x164   :  { %420 = vrot.lane.b32.xlu0 %v415_v33, %s2907_s28  ;;  %2511 = vmatprep.mubr.msk.f32.mxu1 %vm2905_vm1, %v2904_v16  ;;  %v2503_v50 = vpop.f32.mrb[2].mxu0 }
 0x165   :  { %v3163_v51 = vadd.f32 %v2503_v50, %v2368_v49  ;;  %v406_v52 = vpop.f32.mrb[3].mxu0 }
 0x166   :  { %v3165_v53 = vadd.f32 %v2368_v49, %v406_v52 }
 0x167   :  { %422 = vrot.lane.b32.xlu1 %v415_v33, %s2908_s4 }
 0x168   :  { %436 = vrot.lane.b32.xlu0 %v313_v30, %s2908_s4 }
 0x16b   :  { %425 = vrot.lane.b32.xlu1 %v416_v35, %s2906_s26 }
 0x16c   :  { %439 = vrot.lane.b32.xlu0 %v318_v36, %s2906_s26 }
 0x16f   :  { %427 = vrot.lane.b32.xlu1 %v416_v35, %s2907_s28 }
 0x170   :  { %441 = vrot.lane.b32.xlu0 %v318_v36, %s2907_s28 }
 0x173   :  { %429 = vrot.lane.b32.xlu1 %v416_v35, %s2908_s4 }
 0x174   :  { %443 = vrot.lane.b32.xlu0 %v318_v36, %s2908_s4 }
 0x1d1   :  { %v433_v37 = vpop.permute.xlu1 %432  ;;  %v435_v38 = vpop.permute.xlu0 %434 }
 0x1d2   :  { %2510 = vmatpush3.xpose.msk.msra.mxu1 %vm465_vm2, %v433_v37  ;;  %2515 = vmatpush3.xpose.msk.msra.mxu0 %vm465_vm2, %v435_v38 }
 0x1d3   :  { %2524 = vmatprep.subr.mxu0 %v2904_v16  ;;  %2519 = vmatprep.subr.mxu1 %v2904_v16 }
 0x1d5   :  { %v419_v39 = vpop.permute.xlu1 %418 }
 0x1d6   :  { %v421_v40 = vpop.permute.xlu0 %420  ;;  %2512 = vmatmul.mubr.msk.f32.vlgmr.msra.gmra.mrb[4].mxu1 %vm465_vm2, %v419_v39 }
 0x1d7   :  { %2517 = vmatmul.mubr.msk.f32.vlgmr.msra.gmra.mrb[4].mxu0 %vm465_vm2, %v421_v40  ;;  %2521 = vmatprep.mubr.msk.f32.mxu1 %vm2905_vm1, %v2904_v16 }
 0x1d8   :  { %2525 = vmatpush3.xpose.msk.msra.mxu0 %vm465_vm2, %v318_v36  ;;  %2526 = vmatprep.mubr.msk.f32.mxu0 %vm2905_vm1, %v2904_v16 }
 0x1d9   :  { %v423_v41 = vpop.permute.xlu1 %422  ;;  %2534 = vmatprep.subr.mxu0 %v2904_v16 }
 0x1da   :  { %v437_v42 = vpop.permute.xlu0 %436 }
 0x1db   :  { %2520 = vmatpush3.xpose.msk.msra.mxu1 %vm465_vm2, %v437_v42  ;;  %2527 = vmatmul.mubr.msk.f32.vlgmr.msra.gmra.mrb[6].mxu0 %vm465_vm2, %v416_v35 }
 0x1dc   :  { %2529 = vmatprep.subr.mxu1 %v2904_v16  ;;  %2536 = vmatprep.mubr.msk.f32.mxu0 %vm2905_vm1, %v2904_v16 }
 0x1dd   :  { %v426_v43 = vpop.permute.xlu1 %425 }
 0x1de   :  { %v440_v44 = vpop.permute.xlu0 %439  ;;  %2522 = vmatmul.mubr.msk.f32.vlgmr.msra.gmra.mrb[6].mxu1 %vm465_vm2, %v423_v41 }
 0x1df   :  { %2530 = vmatpush3.xpose.msk.msra.mxu1 %vm465_vm2, %v440_v44  ;;  %2531 = vmatprep.mubr.msk.f32.mxu1 %vm2905_vm1, %v2904_v16 }
 0x1e0   :  { %2539 = vmatprep.subr.mxu1 %v2904_v16 }
 0x1e1   :  { %v428_v46 = vpop.permute.xlu1 %427 }
 0x1e2   :  { %v442_v45 = vpop.permute.xlu0 %441  ;;  %2532 = vmatmul.mubr.msk.f32.vlgmr.msra.gmra.mrb[8].mxu1 %vm465_vm2, %v426_v43 }
 0x1e3   :  { %2535 = vmatpush3.xpose.msk.msra.mxu0 %vm465_vm2, %v442_v45  ;;  %2541 = vmatprep.mubr.msk.f32.mxu1 %vm2905_vm1, %v2904_v16 }
 0x1e4   :  { %2544 = vmatprep.subr.mxu0 %v2904_v16 }
 0x1e5   :  { %v430_v48 = vpop.permute.xlu1 %429 }
 0x1e6   :  { %2537 = vmatmul.mubr.msk.f32.vlgmr.msra.gmra.mrb[8].mxu0 %vm465_vm2, %v428_v46  ;;  %v444_v47 = vpop.permute.xlu0 %443 }
 0x1e7   :  { %2540 = vmatpush3.xpose.msk.msra.mxu1 %vm465_vm2, %v444_v47  ;;  %2546 = vmatprep.mubr.msk.f32.mxu0 %vm2905_vm1, %v2904_v16 }
 0x1e8   :  { %2549 = vmatprep.subr.mxu1 %v2904_v16  ;;  %2545 = vmatpush3.msra.mxu0 %v3165_v53 }
 0x1e9   :  { %2554 = vmatprep.subr.mxu0 %v2904_v16 }
 0x1ea   :  { %2542 = vmatmul.mubr.msk.f32.vlgmr.msra.gmra.mrb[10].mxu1 %vm465_vm2, %v430_v48 }
 0x1eb   :  { %2551 = vmatprep.mubr.msk.f32.mxu1 %vm2905_vm1, %v2904_v16 }
 0x236   :  { %v536_v54 = vpop.f32.mrb[2].mxu1 }
 0x237   :  { %v2508_v55 = vpop.f32.mrb[3].mxu1  ;;  %v1058_v56 = vsel %vm465_vm2, %v536_v54, -inf }
 0x238   :  { %1059 = vmax.xlane.f32.xlu0 %v1058_v56 }
 0x2a9   :  { %v610_v57 = vpop.f32.mrb[4].mxu1 }
 0x2aa   :  { %v684_v58 = vpop.f32.mrb[4].mxu0  ;;  %v2513_v59 = vpop.f32.mrb[5].mxu1  ;;  %v1061_v60 = vsel %vm465_vm2, %v610_v57, -inf }
 0x2ab   :  { %v2518_v61 = vpop.f32.mrb[5].mxu0  ;;  %v1064_v62 = vsel %vm465_vm2, %v684_v58, -inf  ;;  %1062 = vmax.xlane.f32.xlu0 %v1061_v60 }
 0x2ac   :  { %1065 = vmax.xlane.f32.xlu1 %v1064_v62 }
 0x2ae   :  { %v832_v63 = vpop.f32.mrb[6].mxu0 }
 0x2af   :  { %v2528_v0 = vpop.f32.mrb[7].mxu0  ;;  %v1070_v1 = vsel %vm465_vm2, %v832_v63, -inf }
 0x2b0   :  { %1071 = vmax.xlane.f32.xlu0 %v1070_v1 }
 0x2b1   :  { %v758_v2 = vpop.f32.mrb[6].mxu1 }
 0x2b2   :  { %v2523_v3 = vpop.f32.mrb[7].mxu1  ;;  %v1067_v4 = vsel %vm465_vm2, %v758_v2, -inf }
 0x2b3   :  { %1068 = vmax.xlane.f32.xlu1 %v1067_v4 }
 0x2b5   :  { %v906_v5 = vpop.f32.mrb[8].mxu1 }
 0x2b6   :  { %v2533_v6 = vpop.f32.mrb[9].mxu1  ;;  %v1073_v7 = vsel %vm465_vm2, %v906_v5, -inf }
 0x2b7   :  { %1074 = vmax.xlane.f32.xlu0 %v1073_v7 }
 0x2b9   :  { %v980_v8 = vpop.f32.mrb[8].mxu0 }
 0x2ba   :  { %v2538_v9 = vpop.f32.mrb[9].mxu0  ;;  %v1076_v10 = vsel %vm465_vm2, %v980_v8, -inf }
 0x2bb   :  { %1077 = vmax.xlane.f32.xlu1 %v1076_v10 }
 0x2bd   :  { %v1054_v11 = vpop.f32.mrb[10].mxu1 }
 0x2be   :  { %v2543_v12 = vpop.f32.mrb[11].mxu1  ;;  %v1079_v13 = vsel %vm465_vm2, %v1054_v11, -inf }
 0x2bf   :  { %1080 = vmax.xlane.f32.xlu0 %v1079_v13 }
 0x2c5   :  { %v1060_v14 = vpop.xlane.xlu0 %1059 }
 0x2c6   :  { %v1082_v15 = vsub.f32 %v536_v54, %v1060_v14 }
 0x2c8   :  { %v1090_v17 = vmul.f32 1.442695, %v1082_v15 }
 0x2ca   :  { %2677 = vpow2.f32 %v1090_v17 }
 0x2cc   :  { %446 = vrot.lane.b32.xlu1 %v3165_v53, %s2906_s26 }
 0x2d4   :  { %v2678_v18 = vpop.eup %2677 }
 0x2d5   :  { %449 = vrot.lane.b32.xlu0 %v3165_v53, %s2907_s28  ;;  %v1106_v19 = vsel %vm465_vm2, %v2678_v18, 0.0 }
 0x2f0   :  { %1107 = vadd.xlane.f32.xlu1 %v1106_v19 }
 0x338   :  { %v1063_v20 = vpop.xlane.xlu0 %1062 }
 0x339   :  { %v1066_v21 = vpop.xlane.xlu1 %1065  ;;  %v1083_v22 = vsub.f32 %v610_v57, %v1063_v20  ;;  %v1730_v20 = vld [vmem:[%s3308_s9] sm:$0xff] }
 0x33a   :  { %v1084_v23 = vsub.f32 %v684_v58, %v1066_v21 }
 0x33b   :  { %v1092_v24 = vmul.f32 1.442695, %v1083_v22 }
 0x33c   :  { %v1094_v25 = vmul.f32 1.442695, %v1084_v23  ;;  %v1731_v23 = vld [vmem:[%s3308_s9 + $0x8] sm:$0xff] }
 0x33d   :  { %2679 = vpow2.f32 %v1092_v24  ;;  %v1072_v26 = vpop.xlane.xlu0 %1071 }
 0x33e   :  { %2681 = vpow2.f32 %v1094_v25  ;;  %v1086_v27 = vsub.f32 %v832_v63, %v1072_v26  ;;  %v1732_v26 = vld [vmem:[%s3308_s9 + $0x10] sm:$0xff] }
 0x340   :  { %v1098_v28 = vmul.f32 1.442695, %v1086_v27  ;;  %v1069_v29 = vpop.xlane.xlu1 %1068 }
 0x341   :  { %v1085_v30 = vsub.f32 %v758_v2, %v1069_v29 }
 0x342   :  { %2683 = vpow2.f32 %v1098_v28 }
 0x343   :  { %v1096_v31 = vmul.f32 1.442695, %v1085_v30 }
 0x344   :  { %v1075_v32 = vpop.xlane.xlu0 %1074 }
 0x345   :  { %2685 = vpow2.f32 %v1096_v31  ;;  %v1087_v33 = vsub.f32 %v906_v5, %v1075_v32 }
 0x347   :  { %v2680_v34 = vpop.eup %2679  ;;  %v1100_v35 = vmul.f32 1.442695, %v1087_v33  ;;  %v1733_v33 = vld [vmem:[%s3308_s9 + $0x18] sm:$0xff] }
 0x348   :  { %v2682_v36 = vpop.eup %2681  ;;  %v1078_v37 = vpop.xlane.xlu1 %1077  ;;  %v1109_v38 = vsel %vm465_vm2, %v2680_v34, 0.0 }
 0x349   :  { %2687 = vpow2.f32 %v1100_v35  ;;  %1110 = vadd.xlane.f32.xlu1 %v1109_v38  ;;  %v1112_v39 = vsel %vm465_vm2, %v2682_v36, 0.0  ;;  %v1088_v47 = vsub.f32 %v980_v8, %v1078_v37 }
 0x34a   :  { %1113 = vadd.xlane.f32.xlu0 %v1112_v39 }
 0x34b   :  { %v1102_v49 = vmul.f32 1.442695, %v1088_v47 }
 0x34c   :  { %v2684_v40 = vpop.eup %2683  ;;  %v447_v41 = vpop.permute.xlu1 %446 }
 0x34d   :  { %2550 = vmatpush3.msra.mxu1 %v447_v41  ;;  %v1118_v42 = vsel %vm465_vm2, %v2684_v40, 0.0  ;;  %v1081_v48 = vpop.xlane.xlu0 %1080  ;;  %2689 = vpow2.f32 %v1102_v49 }
 0x34e   :  { %1119 = vadd.xlane.f32.xlu0 %v1118_v42  ;;  %2559 = vmatprep.subr.mxu1 %v2904_v16  ;;  %v1089_v50 = vsub.f32 %v1054_v11, %v1081_v48  ;;  %v2399_v42 = vld [vmem:[%s3309_s10] ss:$0 sm:$0xff] }
 0x34f   :  { %v2686_v43 = vpop.eup %2685 }
 0x350   :  { %v1115_v44 = vsel %vm465_vm2, %v2686_v43, 0.0  ;;  %v1104_v52 = vmul.f32 1.442695, %v1089_v50 }
 0x351   :  { %1116 = vadd.xlane.f32.xlu1 %v1115_v44  ;;  %v450_v60 = vpop.permute.xlu0 %449 }
 0x352   :  { %2691 = vpow2.f32 %v1104_v52 }
 0x353   :  { %v3187_v45 = vpop.eup %2687 }
 0x354   :  { %v1121_v46 = vsel %vm465_vm2, %v3187_v45, 0.0 }
 0x355   :  { %1122 = vadd.xlane.f32.xlu0 %v1121_v46 }
 0x357   :  { %v3197_v55 = vpop.eup %2689 }
 0x358   :  { %v1124_v56 = vsel %vm465_vm2, %v3197_v55, 0.0 }
 0x35c   :  { %v3201_v57 = vpop.eup %2691 }
 0x35d   :  { %v1127_v59 = vsel %vm465_vm2, %v3201_v57, 0.0 }
 0x362   :  { %456 = vrot.lane.b32.xlu1 %v3163_v51, %s2906_s26 }
 0x36b   :  { %452 = vrot.lane.b32.xlu0 %v3165_v53, %s2908_s4 }
 0x36f   :  { %459 = vrot.lane.b32.xlu0 %v3163_v51, %s2907_s28 }
 0x37d   :  { %v1108_v54 = vpop.xlane.xlu1 %1107 }
 0x37e   :  { %2693 = vrcp.f32 %v1108_v54 }
 0x386   :  { %1125 = vadd.xlane.f32.xlu1 %v1124_v56 }
 0x388   :  { %v2694_v53 = vpop.eup %2693 }
 0x389   :  { %v1131_v58 = vmul.f32 %v2694_v53, %v2678_v18 }
 0x38a   :  { %1128 = vadd.xlane.f32.xlu1 %v1127_v59 }
 0x38b   :  { %2547 = vmatmul.mubr.msk.f32.vlgmr.msra.gmra.mrb[10].mxu0 %vm465_vm2, %v1131_v58 }
 0x38c   :  { %2555 = vmatpush3.msra.mxu0 %v450_v60  ;;  %2556 = vmatprep.mubr.msk.f32.mxu0 %vm2905_vm1, %v2904_v16 }
 0x38d   :  { %2564 = vmatprep.subr.mxu0 %v2904_v16 }
 0x39b   :  { %462 = vrot.lane.b32.xlu1 %v3163_v51, %s2908_s4 }
 0x3d6   :  { %v1111_v61 = vpop.xlane.xlu1 %1110 }
 0x3d7   :  { %2695 = vrcp.f32 %v1111_v61  ;;  %v1114_v62 = vpop.xlane.xlu0 %1113 }
 0x3d8   :  { %2697 = vrcp.f32 %v1114_v62 }
 0x3db   :  { %v1120_v63 = vpop.xlane.xlu0 %1119 }
 0x3dc   :  { %2699 = vrcp.f32 %v1120_v63 }
 0x3de   :  { %v1117_v0 = vpop.xlane.xlu1 %1116 }
 0x3df   :  { %2701 = vrcp.f32 %v1117_v0 }
 0x3e1   :  { %v2696_v1 = vpop.eup %2695 }
 0x3e2   :  { %v2698_v2 = vpop.eup %2697  ;;  %v1133_v3 = vmul.f32 %v2696_v1, %v2680_v34  ;;  %v1123_v4 = vpop.xlane.xlu0 %1122 }
 0x3e3   :  { %v1135_v5 = vmul.f32 %v2698_v2, %v2682_v36  ;;  %2703 = vrcp.f32 %v1123_v4 }
 0x3e4   :  { %2552 = vmatmul.mubr.msk.f32.vlgmr.msra.gmra.mrb[12].mxu1 %vm465_vm2, %v1133_v3 }
 0x3e5   :  { %2557 = vmatmul.mubr.msk.f32.vlgmr.msra.gmra.mrb[12].mxu0 %vm465_vm2, %v1135_v5  ;;  %2561 = vmatprep.mubr.msk.f32.mxu1 %vm2905_vm1, %v2904_v16 }
 0x3e6   :  { %v2700_v6 = vpop.eup %2699  ;;  %2565 = vmatpush3.msra.mxu0 %v3163_v51  ;;  %v453_v7 = vpop.permute.xlu0 %452  ;;  %2566 = vmatprep.mubr.msk.f32.mxu0 %vm2905_vm1, %v2904_v16 }
 0x3e7   :  { %v1139_v8 = vmul.f32 %v2700_v6, %v2684_v40  ;;  %2560 = vmatpush3.msra.mxu1 %v453_v7  ;;  %2574 = vmatprep.subr.mxu0 %v2904_v16  ;;  %v457_v51 = vpop.permute.xlu1 %456 }
 0x3e8   :  { %2569 = vmatprep.subr.mxu1 %v2904_v16 }
 0x3e9   :  { %v2702_v9 = vpop.eup %2701  ;;  %2567 = vmatmul.mubr.msk.f32.vlgmr.msra.gmra.mrb[14].mxu0 %vm465_vm2, %v1139_v8 }
 0x3ea   :  { %v1137_v10 = vmul.f32 %v2702_v9, %v2686_v43  ;;  %v460_v11 = vpop.permute.xlu0 %459  ;;  %2576 = vmatprep.mubr.msk.f32.mxu0 %vm2905_vm1, %v2904_v16 }
 0x3eb   :  { %2575 = vmatpush3.msra.mxu0 %v460_v11 }
 0x3ec   :  { %2562 = vmatmul.mubr.msk.f32.vlgmr.msra.gmra.mrb[14].mxu1 %vm465_vm2, %v1137_v10  ;;  %2584 = vmatprep.subr.mxu0 %v2904_v16 }
 0x3ed   :  { %v2704_v12 = vpop.eup %2703  ;;  %2570 = vmatpush3.msra.mxu1 %v457_v51  ;;  %2571 = vmatprep.mubr.msk.f32.mxu1 %vm2905_vm1, %v2904_v16 }
 0x3ee   :  { %v1141_v13 = vmul.f32 %v2704_v12, %v3187_v45  ;;  %2579 = vmatprep.subr.mxu1 %v2904_v16 }
 0x3f0   :  { %2572 = vmatmul.mubr.msk.f32.vlgmr.msra.gmra.mrb[16].mxu1 %vm465_vm2, %v1141_v13 }
 0x3f1   :  { %2581 = vmatprep.mubr.msk.f32.mxu1 %vm2905_vm1, %v2904_v16 }
 0x413   :  { %v1126_v14 = vpop.xlane.xlu1 %1125 }
 0x414   :  { %2705 = vrcp.f32 %v1126_v14 }
 0x417   :  { %v1129_v15 = vpop.xlane.xlu1 %1128 }
 0x418   :  { %2707 = vrcp.f32 %v1129_v15 }
 0x41b   :  { %v463_v17 = vpop.permute.xlu1 %462 }
 0x41c   :  { %2580 = vmatpush3.msra.mxu1 %v463_v17 }
 0x41d   :  { %2604 = vmatprep.subr.mxu1 %v2904_v16 }
 0x41e   :  { %v2706_v18 = vpop.eup %2705 }
 0x41f   :  { %v1143_v19 = vmul.f32 %v2706_v18, %v3197_v55 }
 0x421   :  { %2577 = vmatmul.mubr.msk.f32.vlgmr.msra.gmra.mrb[16].mxu0 %vm465_vm2, %v1143_v19 }
 0x422   :  { %v2708_v21 = vpop.eup %2707  ;;  %2585 = vmatpush3.msra.mxu0 %v1730_v20  ;;  %2586 = vmatprep.mubr.msk.f32.mxu0 %vm2905_vm1, %v2904_v16 }
 0x423   :  { %v1145_v22 = vmul.f32 %v2708_v21, %v3201_v57  ;;  %2589 = vmatprep.subr.mxu0 %v2904_v16 }
 0x425   :  { %2582 = vmatmul.mubr.msk.f32.vlgmr.msra.gmra.mrb[18].mxu1 %vm465_vm2, %v1145_v22 }
 0x426   :  { %2605 = vmatpush3.msra.mxu1 %v1730_v20  ;;  %2606 = vmatprep.mubr.msk.f32.mxu1 %vm2905_vm1, %v2904_v16 }
 0x427   :  { %2609 = vmatprep.subr.mxu1 %v2904_v16 }
 0x45e   :  { %v1215_v24 = vpop.f32.mrb[10].mxu0 }
 0x45f   :  { %v2548_v25 = vpop.f32.mrb[11].mxu0  ;;  %2587 = vmatmul.mubr.msk.f32.vlgmr.msra.gmra.mrb[18].mxu0 %vm465_vm2, %v1215_v24 }
 0x460   :  { %2590 = vmatpush3.msra.mxu0 %v1731_v23  ;;  %2591 = vmatprep.mubr.msk.f32.mxu0 %vm2905_vm1, %v2904_v16 }
 0x461   :  { %2594 = vmatprep.subr.mxu0 %v2904_v16 }
 0x4b7   :  { %v1288_v27 = vpop.f32.mrb[12].mxu1 }
 0x4b8   :  { %v1361_v28 = vpop.f32.mrb[12].mxu0  ;;  %v2553_v29 = vpop.f32.mrb[13].mxu1  ;;  %2592 = vmatmul.mubr.msk.f32.vlgmr.msra.gmra.mrb[18].mxu0 %vm465_vm2, %v1288_v27 }
 0x4b9   :  { %v2558_v30 = vpop.f32.mrb[13].mxu0  ;;  %2595 = vmatpush3.msra.mxu0 %v1732_v26  ;;  %2596 = vmatprep.mubr.msk.f32.mxu0 %vm2905_vm1, %v2904_v16 }
 0x4ba   :  { %2599 = vmatprep.subr.mxu0 %v2904_v16 }
 0x4bc   :  { %v1507_v31 = vpop.f32.mrb[14].mxu0 }
 0x4bd   :  { %v2568_v32 = vpop.f32.mrb[15].mxu0  ;;  %2607 = vmatmul.mubr.msk.f32.vlgmr.msra.gmra.mrb[20].mxu1 %vm465_vm2, %v1507_v31 }
 0x4be   :  { %2610 = vmatpush3.msra.mxu1 %v1731_v23  ;;  %2611 = vmatprep.mubr.msk.f32.mxu1 %vm2905_vm1, %v2904_v16 }
 0x4bf   :  { %v1434_v34 = vpop.f32.mrb[14].mxu1  ;;  %2614 = vmatprep.subr.mxu1 %v2904_v16 }
 0x4c0   :  { %v2563_v35 = vpop.f32.mrb[15].mxu1  ;;  %2597 = vmatmul.mubr.msk.f32.vlgmr.msra.gmra.mrb[18].mxu0 %vm465_vm2, %v1361_v28 }
 0x4c1   :  { %2600 = vmatpush3.msra.mxu0 %v1733_v33  ;;  %2601 = vmatprep.mubr.msk.f32.mxu0 %vm2905_vm1, %v2904_v16 }
 0x4c3   :  { %v1580_v36 = vpop.f32.mrb[16].mxu1 }
 0x4c4   :  { %v2573_v37 = vpop.f32.mrb[17].mxu1 }
 0x4c5   :  { %2612 = vmatmul.mubr.msk.f32.vlgmr.msra.gmra.mrb[20].mxu1 %vm465_vm2, %v1580_v36 }
 0x4c6   :  { %2615 = vmatpush3.msra.mxu1 %v1732_v26  ;;  %2616 = vmatprep.mubr.msk.f32.mxu1 %vm2905_vm1, %v2904_v16 }
 0x4c7   :  { %2619 = vmatprep.subr.mxu1 %v2904_v16 }
 0x4c8   :  { %2602 = vmatmul.mubr.msk.f32.vlgmr.msra.gmra.mrb[18].mxu0 %vm465_vm2, %v1434_v34 }
 0x4f4   :  { %v1653_v38 = vpop.f32.mrb[16].mxu0 }
 0x4f5   :  { %v2578_v39 = vpop.f32.mrb[17].mxu0  ;;  %2617 = vmatmul.mubr.msk.f32.vlgmr.msra.gmra.mrb[20].mxu1 %vm465_vm2, %v1653_v38 }
 0x4f6   :  { %2620 = vmatpush3.msra.mxu1 %v1733_v33  ;;  %2621 = vmatprep.mubr.msk.f32.mxu1 %vm2905_vm1, %v2904_v16 }
 0x4f8   :  { %v1726_v40 = vpop.f32.mrb[18].mxu1 }
 0x4f9   :  { %v2583_v41 = vpop.f32.mrb[19].mxu1 }
 0x4fd   :  { %2622 = vmatmul.mubr.msk.f32.vlgmr.msra.gmra.mrb[20].mxu1 %vm465_vm2, %v1726_v40 }
 0x59b   :  { %v2022_v43 = vpop.f32.mrb[18].mxu0 }
 0x59c   :  { %v2648_v44 = vadd.f32 %v2399_v42, %v2022_v43  ;;  %v2603_v45 = vpop.f32.mrb[19].mxu0 }
 0x59e   :  { %2037 = vst.msk [vmem:[#allocation14] sm:$0xff] %vm145_vm0, %v2648_v44 }
 0x5d0   :  { %v2326_v46 = vpop.f32.mrb[20].mxu1 }
 0x5d1   :  { %v2649_v47 = vadd.f32 %v2399_v42, %v2326_v46  ;;  %v2623_v48 = vpop.f32.mrb[21].mxu1 }
 0x5d3   :  { %2341 = vst.msk [vmem:[#allocation14 + $0x8] sm:$0xff] %vm145_vm0, %v2649_v47 }
 0x5d4   :  { %2874 = shalt.err (!%p2871_p4)
}
 0x5d5   :  { %s2875_s22 = scalar_lea.hbm %s3310_s11, 256 }
 0x5d6   :  { %p2876_p5 = scmp.ne.s32.totalorder %s3310_s11, %s2875_s22  ;;  %p2879_p6 = scmp.lt.u32.totalorder %s2875_s22, %s3310_s11 }
 0x5d8   :  { %p2881_p7 = pnand %p2879_p6, %p2876_p5 }
 0x5da   :  { %2884 = shalt.err (!%p2881_p7)
}
 0x5db   :  { %2353 = dma.vmem_to_hbm [thread:$0]  %s2348_s20, 256, %s3310_s11, [#allocation4], %s2897_s29, %s2897_s29, %s2898_s30  }
 0x5dc   :  { %2893 = dma.done.wait [#allocation4], 256  }
 0x5dd   :  { %2894 = vsyncadd [#allocation4], 4294967040 }
 0x5de   :  { %2357 = vsyncpa [#allocation3], 1 }
 0x5df   :  { %2358 = vsyncpa [#allocation6], 1 }
 0x5e0   :  { %2359 = vsyncpa [#allocation9], 1 }
 0x5e1   :  { %2360 = vsyncpa [#allocation12], 1 }
 0x5e2   :  { %2361 = vsyncpa [#allocation4], 1 }

</bundles_post_ra>
